<compile_context>
chip_gen: v7x
topology: tpu7x:2x2x1
jax: 0.10.0
libtpu: 0.0.40
codegen_flags: <defaults>
</compile_context>

<pallas_src>
import jax
import jax.numpy as jnp
from jax.experimental import pallas as pl
from jax.experimental.pallas import tpu as pltpu


LANE = 128      # last dim must be a multiple of this to be lane-dense
SUBLANE = 8     # f32 sublane packing
TM_MAX = 512    # rows per grid step; fits comfortably in the default scoped
                # VMEM limit for D up to ~1024 on v5e/v6e/v7x.  For much larger
                # D, lower TM_MAX or raise vmem_limit_bytes.


def _round_up(n, m):
    return ((n + m - 1) // m) * m


def ffn_kernel(x_ref, w1_ref, b1_ref, w2_ref, b2_ref, o_ref):
    """One (TM, Dp) row tile: y = relu(x @ W1 + b1) @ W2 + b2 (dropout=identity)."""
    x = x_ref[...]                                                # (TM, Dp)
    # lr1 on the MXU, f32 accumulation
    h = jnp.dot(x, w1_ref[...], preferred_element_type=jnp.float32)
    # dropout(eval)=identity, then bias + ReLU on the VPU (stays in vregs)
    h = jnp.maximum(h + b1_ref[...], 0.0)
    # lr2 on the MXU
    y = jnp.dot(h.astype(x.dtype), w2_ref[...],
                preferred_element_type=jnp.float32)
    # dropout(eval)=identity
    o_ref[...] = (y + b2_ref[...]).astype(o_ref.dtype)


def ffn_prepare_params(w1, b1, w2, b2):
    """One-time weight prep (call OUTSIDE the hot path and cache the result).

    - transpose PyTorch (out, in) -> (in, out) so the kernel is plain x @ W
    - zero-pad the feature dim to a multiple of 128 lanes so all blocks
      (weights, biases, activations, output) are lane-dense.
    Zero padding is exact: padded columns stay identically zero through
    matmul / bias / ReLU and are sliced off in ffn_forward.
    """
    D = w1.shape[0]
    Dp = _round_up(D, LANE)
    pad = Dp - D
    w1_t = jnp.pad(w1.T, ((0, pad), (0, pad)))
    w2_t = jnp.pad(w2.T, ((0, pad), (0, pad)))
    b1_p = jnp.pad(b1, (0, pad)).reshape(1, Dp)
    b2_p = jnp.pad(b2, (0, pad)).reshape(1, Dp)
    return (w1_t, b1_p, w2_t, b2_p)


def ffn_forward(x, params):
    """x: (..., D) with D = state_size.  params from ffn_prepare_params."""
    w1_t, b1_p, w2_t, b2_p = params
    Dp = w1_t.shape[0]
    orig_shape = x.shape
    D = orig_shape[-1]

    x2d = x.reshape(-1, D)                      # (M, D)
    M = x2d.shape[0]

    # Row tile: multiple of 8 (f32 sublanes), capped at TM_MAX so the per-step
    # footprint (2x double-buffered x/out tiles + resident weights + f32
    # intermediate) stays well under the scoped VMEM limit on every generation
    # (incl. v7x's smaller 64 MiB VMEM).
    TM = min(TM_MAX, _round_up(M, SUBLANE))
    Mp = _round_up(M, TM)

    # Zero-pad rows (grid remainder) and features (lane density); both are
    # exact zeros through the FFN and are sliced off below.
    x_p = jnp.pad(x2d, ((0, Mp - M), (0, Dp - D)))

    out = pl.pallas_call(
        ffn_kernel,
        out_shape=jax.ShapeDtypeStruct((Mp, Dp), x.dtype),
        grid_spec=pltpu.PrefetchScalarGridSpec(
            num_scalar_prefetch=0,
            grid=(Mp // TM,),
            in_specs=[
                pl.BlockSpec((TM, Dp), lambda i: (i, 0)),   # x row tile (pipelined)
                pl.BlockSpec((Dp, Dp), lambda i: (0, 0)),   # W1^T  (VMEM resident)
                pl.BlockSpec((1, Dp), lambda i: (0, 0)),    # b1    (VMEM resident)
                pl.BlockSpec((Dp, Dp), lambda i: (0, 0)),   # W2^T  (VMEM resident)
                pl.BlockSpec((1, Dp), lambda i: (0, 0)),    # b2    (VMEM resident)
            ],
            out_specs=pl.BlockSpec((TM, Dp), lambda i: (i, 0)),
        ),
        compiler_params=pltpu.CompilerParams(
            # Row-parallel: lets v7x shard grid steps across its 2 TensorCores;
            # measured ~no-op on single-TC v5e/v6e.
            dimension_semantics=("parallel",)),
    )(x_p, w1_t, b1_p, w2_t, b2_p)

    return out[:M, :D].reshape(orig_shape)


if __name__ == "__main__":
    def init_linear(key, d):
        # Mimic nn.Linear default init: U(-1/sqrt(in), 1/sqrt(in))
        kw, kb = jax.random.split(key)
        bound = 1.0 / (d ** 0.5)
        w = jax.random.uniform(kw, (d, d), minval=-bound, maxval=bound,
                               dtype=jnp.float32)
        b = jax.random.uniform(kb, (d,), minval=-bound, maxval=bound,
                               dtype=jnp.float32)
        return w, b

    def ref_ffn(x, w1, b1, w2, b2):
        # Pure-JAX reference (eval-mode dropout == identity).
        return jnp.maximum(x @ w1.T + b1, 0.0) @ w2.T + b2

    key = jax.random.PRNGKey(0)

    # Primary check: module-default state_size=256 (already lane-dense).
    batch, seq, state_size = 2, 8, 256
    kx, k1, k2, kx2, k3, k4 = jax.random.split(key, 6)

    x = jax.random.normal(kx, (batch, seq, state_size), dtype=jnp.float32)
    w1, b1 = init_linear(k1, state_size)
    w2, b2 = init_linear(k2, state_size)

    params = ffn_prepare_params(w1, b1, w2, b2)   # one-time, outside hot path
    y = ffn_forward(x, params)
    jax.block_until_ready(y)

    assert y.shape == x.shape
    assert jnp.allclose(y, ref_ffn(x, w1, b1, w2, b2), atol=1e-5, rtol=1e-5), \
        "mismatch vs reference (D=256)"

    # Secondary check: small non-lane-aligned feature dim exercises the
    # zero-pad-to-128-lanes path.
    d_small = 32
    xs = jax.random.normal(kx2, (batch, seq, d_small), dtype=jnp.float32)
    w1s, b1s = init_linear(k3, d_small)
    w2s, b2s = init_linear(k4, d_small)
    ys = ffn_forward(xs, ffn_prepare_params(w1s, b1s, w2s, b2s))
    jax.block_until_ready(ys)
    assert jnp.allclose(ys, ref_ffn(xs, w1s, b1s, w2s, b2s),
                        atol=1e-5, rtol=1e-5), "mismatch vs reference (D=32)"

    print("KERNEL_OK")
</pallas_src>

<mosaic_0001>
module attributes {stable_mosaic.version = 11 : i64} {
  func.func @ffn_kernel(%arg0: i32, %arg1: memref<16x256xf32, #tpu.memory_space<vmem>>, %arg2: memref<256x256xf32, #tpu.memory_space<vmem>>, %arg3: memref<1x256xf32, #tpu.memory_space<vmem>>, %arg4: memref<256x256xf32, #tpu.memory_space<vmem>>, %arg5: memref<1x256xf32, #tpu.memory_space<vmem>>, %arg6: memref<16x256xf32, #tpu.memory_space<vmem>>) attributes {dimension_semantics = [#tpu.dimension_semantics<parallel>], iteration_bounds = array<i64: 1>, scalar_prefetch = 0 : i64, scratch_operands = 0 : i64, tpu.core_type = #tpu.core_type<tc>, window_params = [{transform_indices = @transform_0, window_bounds = array<i64: 16, 256>}, {pipeline_mode = #tpu.pipeline_mode<synchronous>, transform_indices = @transform_1, window_bounds = array<i64: 256, 256>}, {pipeline_mode = #tpu.pipeline_mode<synchronous>, transform_indices = @transform_2, window_bounds = array<i64: 1, 256>}, {pipeline_mode = #tpu.pipeline_mode<synchronous>, transform_indices = @transform_3, window_bounds = array<i64: 256, 256>}, {pipeline_mode = #tpu.pipeline_mode<synchronous>, transform_indices = @transform_4, window_bounds = array<i64: 1, 256>}, {transform_indices = @transform_5, window_bounds = array<i64: 16, 256>}]} {
    %c0 = arith.constant 0 : index
    %c0_0 = arith.constant 0 : index
    %0 = vector.load %arg1[%c0, %c0_0] : memref<16x256xf32, #tpu.memory_space<vmem>>, vector<16x256xf32>
    %c0_1 = arith.constant 0 : index
    %c0_2 = arith.constant 0 : index
    %1 = vector.load %arg2[%c0_1, %c0_2] : memref<256x256xf32, #tpu.memory_space<vmem>>, vector<256x256xf32>
    %cst = arith.constant dense<0.000000e+00> : vector<16x256xf32>
    %2 = tpu.matmul %0, %1, %cst {dimension_numbers = #tpu.dot_dimension_numbers<[1], [0], [0], [1], [0, 0, 1, 1], [], []>} : vector<16x256xf32>, vector<256x256xf32>, vector<16x256xf32> -> vector<16x256xf32>
    %c0_3 = arith.constant 0 : index
    %c0_4 = arith.constant 0 : index
    %3 = vector.load %arg3[%c0_3, %c0_4] : memref<1x256xf32, #tpu.memory_space<vmem>>, vector<1x256xf32>
    %4 = vector.broadcast %3 : vector<1x256xf32> to vector<16x256xf32>
    %5 = arith.addf %2, %4 : vector<16x256xf32>
    %cst_5 = arith.constant 0.000000e+00 : f32
    %6 = vector.broadcast %cst_5 : f32 to vector<16x256xf32>
    %7 = arith.maximumf %5, %6 : vector<16x256xf32>
    %c0_6 = arith.constant 0 : index
    %c0_7 = arith.constant 0 : index
    %8 = vector.load %arg4[%c0_6, %c0_7] : memref<256x256xf32, #tpu.memory_space<vmem>>, vector<256x256xf32>
    %cst_8 = arith.constant dense<0.000000e+00> : vector<16x256xf32>
    %9 = tpu.matmul %7, %8, %cst_8 {dimension_numbers = #tpu.dot_dimension_numbers<[1], [0], [0], [1], [0, 0, 1, 1], [], []>} : vector<16x256xf32>, vector<256x256xf32>, vector<16x256xf32> -> vector<16x256xf32>
    %c0_9 = arith.constant 0 : index
    %c0_10 = arith.constant 0 : index
    %10 = vector.load %arg5[%c0_9, %c0_10] : memref<1x256xf32, #tpu.memory_space<vmem>>, vector<1x256xf32>
    %11 = vector.broadcast %10 : vector<1x256xf32> to vector<16x256xf32>
    %12 = arith.addf %9, %11 : vector<16x256xf32>
    %c0_11 = arith.constant 0 : index
    %c0_12 = arith.constant 0 : index
    %13 = vector.load %arg6[%c0_11, %c0_12] : memref<16x256xf32, #tpu.memory_space<vmem>>, vector<16x256xf32>
    tpu.vector_store %arg6[%c0_11, %c0_12], %12 {strides = array<i32>} : memref<16x256xf32, #tpu.memory_space<vmem>>, vector<16x256xf32>,
    return
  }
  func.func @transform_0(%arg0: i32) -> (i32, i32) {
    %c0_i32 = arith.constant 0 : i32
    %c0_i32_0 = arith.constant 0 : i32
    return %arg0, %c0_i32 : i32, i32
  }
  func.func @transform_1(%arg0: i32) -> (i32, i32) {
    %c0_i32 = arith.constant 0 : i32
    %c0_i32_0 = arith.constant 0 : i32
    %c0_i32_1 = arith.constant 0 : i32
    return %c0_i32, %c0_i32_0 : i32, i32
  }
  func.func @transform_2(%arg0: i32) -> (i32, i32) {
    %c0_i32 = arith.constant 0 : i32
    %c0_i32_0 = arith.constant 0 : i32
    %c0_i32_1 = arith.constant 0 : i32
    return %c0_i32, %c0_i32_0 : i32, i32
  }
  func.func @transform_3(%arg0: i32) -> (i32, i32) {
    %c0_i32 = arith.constant 0 : i32
    %c0_i32_0 = arith.constant 0 : i32
    %c0_i32_1 = arith.constant 0 : i32
    return %c0_i32, %c0_i32_0 : i32, i32
  }
  func.func @transform_4(%arg0: i32) -> (i32, i32) {
    %c0_i32 = arith.constant 0 : i32
    %c0_i32_0 = arith.constant 0 : i32
    %c0_i32_1 = arith.constant 0 : i32
    return %c0_i32, %c0_i32_0 : i32, i32
  }
  func.func @transform_5(%arg0: i32) -> (i32, i32) {
    %c0_i32 = arith.constant 0 : i32
    %c0_i32_0 = arith.constant 0 : i32
    return %arg0, %c0_i32 : i32, i32
  }
}

</mosaic_0001>

<bundles_post_ra>
// kernel: tpu_custom_call.1
= control target key start
LH: loop header
LB: loop body
LE: loop exit
PB: predicated region body
PF: predicated region fallthrough
CT: control target
= control target key end

     0   :  { %10 = vsyncpa [#allocation3], 0  ;;  %s735_s0 = inlined_call_operand.hbm [shape: f32[16,256], index: 0, kind: input, shape index: {}]   ;;  %s736_s1 = inlined_call_operand.hbm [shape: f32[256,256], index: 1, kind: input, shape index: {}]   ;;  %s737_s2 = inlined_call_operand.vmem [shape: f32[1,256], index: 2, kind: input, shape index: {}]   ;;  %s738_s3 = inlined_call_operand.hbm [shape: f32[256,256], index: 3, kind: input, shape index: {}]   ;;  %s739_s4 = inlined_call_operand.vmem [shape: f32[1,256], index: 4, kind: input, shape index: {}]   ;;  %s740_s5 = inlined_call_operand.hbm [shape: f32[16,256], index: 5, kind: output, shape index: {}]  }
   0x1   :  { %11 = vsyncpa [#allocation6], 0 }
   0x2   :  { %12 = vsyncpa [#allocation4], 0  ;;  %s626_s18 = smov [#allocation5]   ;;  %s627_s20 = smov [#allocation2]  }
   0x3   :  { %s30_s19 = sshll.u32 %s626_s18, 4  ;;  %s18_s21 = sshll.u32 %s627_s20, 4  ;;  %s31_s19 = int_to_ptr.vmem [resolvable:$true] %s30_s19  ;;  %s662_s21 = int_to_ptr.vmem [resolvable:$true] %s18_s21 }
   0x4   :  { %s532_s24 = scalar_lea.hbm %s736_s1, 8192 }
   0x5   :  { %p533_p0 = scmp.ne.s32.totalorder %s736_s1, %s532_s24  ;;  %p536_p1 = scmp.lt.u32.totalorder %s532_s24, %s736_s1 }
   0x7   :  { %p538_p2 = pnand %p536_p1, %p533_p0 }
   0x9   :  { %541 = shalt.err (!%p538_p2)
}
   0xa   :  { %s542_s29 = scalar_lea.vmem %s31_s19, 8192  ;;  %p547_p4 = scmp.lt.s32.totalorder %s31_s19, %s31_s19 }
   0xb   :  { %p543_p3 = scmp.ne.s32.totalorder %s31_s19, %s542_s29  ;;  %p548_p5 = scmp.lt.s32.totalorder %s542_s29, %s542_s29 }
   0xd   :  { %p549_p6 = por %p548_p5, %p547_p4 }
   0xf   :  { %p550_p7 = pnand %p549_p6, %p543_p3 }
  0x11   :  { %553 = shalt.err (!%p550_p7)
}
  0x12   :  { %s628_s30 = smov 256   ;;  %s629_s6 = smov 16  }
  0x13   :  { %36 = dma.hbm_to_vmem [thread:$0]  %s736_s1, 8192, %s31_s19, [#allocation6], %s628_s30, %s628_s30, %s629_s6  }
  0x14   :  { %s554_s11 = scalar_lea.hbm %s735_s0, 512 }
  0x15   :  { %p555_p8 = scmp.ne.s32.totalorder %s735_s0, %s554_s11  ;;  %p558_p9 = scmp.lt.u32.totalorder %s554_s11, %s735_s0 }
  0x17   :  { %p560_p10 = pnand %p558_p9, %p555_p8 }
  0x19   :  { %563 = shalt.err (!%p560_p10)
}
  0x1a   :  { %s564_s16 = scalar_lea.vmem %s662_s21, 512  ;;  %p569_p12 = scmp.lt.s32.totalorder %s662_s21, %s662_s21 }
  0x1b   :  { %p565_p11 = scmp.ne.s32.totalorder %s662_s21, %s564_s16  ;;  %p570_p13 = scmp.lt.s32.totalorder %s564_s16, %s564_s16 }
  0x1d   :  { %p571_p0 = por %p570_p13, %p569_p12 }
  0x1f   :  { %p572_p1 = pnand %p571_p0, %p565_p11 }
  0x21   :  { %575 = shalt.err (!%p572_p1)
}
  0x22   :  { %24 = dma.hbm_to_vmem [thread:$0]  %s735_s0, 512, %s662_s21, [#allocation3], %s628_s30, %s628_s30, %s629_s6  }
  0x23   :  { %s630_s18 = smov [#allocation7]   ;;  %s576_s23 = scalar_lea.hbm %s738_s3, 8192 }
  0x24   :  { %s44_s19 = sshll.u32 %s630_s18, 4  ;;  %p577_p2 = scmp.ne.s32.totalorder %s738_s3, %s576_s23  ;;  %s45_s19 = int_to_ptr.vmem [resolvable:$true] %s44_s19 }
  0x25   :  { %p580_p3 = scmp.lt.u32.totalorder %s576_s23, %s738_s3 }
  0x27   :  { %p582_p4 = pnand %p580_p3, %p577_p2 }
  0x29   :  { %585 = shalt.err (!%p582_p4)
}
  0x2a   :  { %s586_s28 = scalar_lea.vmem %s45_s19, 8192  ;;  %p591_p6 = scmp.lt.s32.totalorder %s45_s19, %s45_s19 }
  0x2b   :  { %p587_p5 = scmp.ne.s32.totalorder %s45_s19, %s586_s28  ;;  %p592_p7 = scmp.lt.s32.totalorder %s586_s28, %s586_s28 }
  0x2d   :  { %p593_p8 = por %p592_p7, %p591_p6 }
  0x2f   :  { %p594_p9 = pnand %p593_p8, %p587_p5 }
  0x31   :  { %597 = shalt.err (!%p594_p9)
}
  0x32   :  { %50 = dma.hbm_to_vmem [thread:$0]  %s738_s3, 8192, %s45_s19, [#allocation6], %s628_s30, %s628_s30, %s629_s6  }
  0x33   :  { %620 = dma.done.wait [#allocation3], 512  }
  0x34   :  { %621 = vsyncadd [#allocation3], 4294966784 }
  0x35   :  { %622 = dma.done.wait [#allocation6], 16384  }
  0x36   :  { %623 = vsyncadd [#allocation6], 4294950912  ;;  %v67_v0 = vld [vmem:[#allocation5 + $0x8] sm:$0xff]  ;;  %v69_v1 = vld [vmem:[#allocation5 + $0x18] sm:$0xff]  ;;  %s631_s8 = smov [#allocation8]  }
  0x37   :  { %v66_v2 = vld [vmem:[#allocation5] sm:$0xff]  ;;  %v398_v3 = vpack.c.bf16 %v69_v1, %v67_v0  ;;  %v68_v4 = vld [vmem:[#allocation5 + $0x10] sm:$0xff]  ;;  %v71_v5 = vld [vmem:[#allocation5 + $0x28] sm:$0xff]  ;;  %s385_s9 = sshll.u32 %s631_s8, 4  ;;  %s386_s9 = int_to_ptr.vmem [resolvable:$true] %s385_s9 }
  0x38   :  { %v73_v6 = vld [vmem:[#allocation5 + $0x38] sm:$0xff]  ;;  %v400_v7 = vpack.c.bf16 %v68_v4, %v66_v2  ;;  %v70_v9 = vld [vmem:[#allocation5 + $0x20] sm:$0xff]  ;;  %v72_v10 = vld [vmem:[#allocation5 + $0x30] sm:$0xff]  ;;  %s598_s10 = scalar_lea.vmem %s386_s9, 512  ;;  %p603_p11 = scmp.lt.s32.totalorder %s386_s9, %s386_s9 }
  0x39   :  { %v402_v8 = vpack.c.bf16 %v73_v6, %v71_v5  ;;  %v75_v11 = vld [vmem:[#allocation5 + $0x48] sm:$0xff]  ;;  %399 = vmatprep.subr.bf16.mxu0 %v398_v3  ;;  %v77_v12 = vld [vmem:[#allocation5 + $0x58] sm:$0xff]  ;;  %v404_v13 = vpack.c.bf16 %v72_v10, %v70_v9  ;;  %v74_v15 = vld [vmem:[#allocation5 + $0x40] sm:$0xff]  ;;  %p599_p10 = scmp.ne.s32.totalorder %s386_s9, %s598_s10  ;;  %p604_p12 = scmp.lt.s32.totalorder %s598_s10, %s598_s10 }
  0x3a   :  { %401 = vmatpush1.bf16.msra.mxu0 %v400_v7  ;;  %v406_v14 = vpack.c.bf16 %v77_v12, %v75_v11  ;;  %v76_v16 = vld [vmem:[#allocation5 + $0x50] sm:$0xff]  ;;  %v79_v17 = vld [vmem:[#allocation5 + $0x68] sm:$0xff]  ;;  %v81_v18 = vld [vmem:[#allocation5 + $0x78] sm:$0xff] }
  0x3b   :  { %403 = vmatprep.subr.bf16.mxu0 %v402_v8  ;;  %v408_v19 = vpack.c.bf16 %v76_v16, %v74_v15  ;;  %v410_v20 = vpack.c.bf16 %v81_v18, %v79_v17  ;;  %v78_v21 = vld [vmem:[#allocation5 + $0x60] sm:$0xff]  ;;  %v80_v22 = vld [vmem:[#allocation5 + $0x70] sm:$0xff]  ;;  %v83_v23 = vld [vmem:[#allocation5 + $0x88] sm:$0xff]  ;;  %p605_p13 = por %p604_p12, %p603_p11 }
  0x3c   :  { %v85_v24 = vld [vmem:[#allocation5 + $0x98] sm:$0xff]  ;;  %v412_v25 = vpack.c.bf16 %v80_v22, %v78_v21  ;;  %v82_v27 = vld [vmem:[#allocation5 + $0x80] sm:$0xff]  ;;  %v84_v28 = vld [vmem:[#allocation5 + $0x90] sm:$0xff] }
  0x3d   :  { %v414_v26 = vpack.c.bf16 %v85_v24, %v83_v23  ;;  %v87_v29 = vld [vmem:[#allocation5 + $0xa8] sm:$0xff]  ;;  %v89_v30 = vld [vmem:[#allocation5 + $0xb8] sm:$0xff]  ;;  %v416_v31 = vpack.c.bf16 %v84_v28, %v82_v27  ;;  %v86_v33 = vld [vmem:[#allocation5 + $0xa0] sm:$0xff]  ;;  %p606_p0 = pnand %p605_p13, %p599_p10 }
  0x3e   :  { %405 = vmatpush1.bf16.msra.mxu0 %v404_v13  ;;  %v418_v32 = vpack.c.bf16 %v89_v30, %v87_v29  ;;  %v88_v34 = vld [vmem:[#allocation5 + $0xb0] sm:$0xff]  ;;  %v91_v35 = vld [vmem:[#allocation5 + $0xc8] sm:$0xff]  ;;  %v93_v36 = vld [vmem:[#allocation5 + $0xd8] sm:$0xff] }
  0x3f   :  { %407 = vmatprep.subr.bf16.mxu0 %v406_v14  ;;  %v420_v37 = vpack.c.bf16 %v88_v34, %v86_v33  ;;  %v422_v38 = vpack.c.bf16 %v93_v36, %v91_v35  ;;  %v90_v39 = vld [vmem:[#allocation5 + $0xc0] sm:$0xff]  ;;  %v92_v40 = vld [vmem:[#allocation5 + $0xd0] sm:$0xff]  ;;  %v63_v41 = vld [vmem:[#allocation2 + $0x8] sm:$0xff] }
  0x40   :  { %v95_v42 = vld [vmem:[#allocation5 + $0xe8] sm:$0xff]  ;;  %v97_v43 = vld [vmem:[#allocation5 + $0xf8] sm:$0xff]  ;;  %206 = vmatprep.mubr.f32.mxu0 %v63_v41  ;;  %v94_v45 = vld [vmem:[#allocation5 + $0xe0] sm:$0xff]  ;;  %v424_v50 = vpack.c.bf16 %v92_v40, %v90_v39 }
  0x41   :  { %v224_v44 = vld [vmem:[#allocation7 + $0x8] sm:$0xff]  ;;  %v96_v46 = vld [vmem:[#allocation5 + $0xf0] sm:$0xff]  ;;  %v226_v47 = vld [vmem:[#allocation7 + $0x18] sm:$0xff]  ;;  %v426_v56 = vpack.c.bf16 %v97_v43, %v95_v42 }
  0x42   :  { %409 = vmatpush1.bf16.msra.mxu0 %v408_v19  ;;  %v223_v48 = vld [vmem:[#allocation7] sm:$0xff]  ;;  %v225_v49 = vld [vmem:[#allocation7 + $0x10] sm:$0xff]  ;;  %v462_v51 = vpack.c.bf16 %v226_v47, %v224_v44  ;;  %v228_v53 = vld [vmem:[#allocation7 + $0x28] sm:$0xff]  ;;  %v428_v0 = vpack.c.bf16 %v96_v46, %v94_v45 }
  0x43   :  { %411 = vmatprep.subr.bf16.mxu0 %v410_v20  ;;  %v464_v52 = vpack.c.bf16 %v225_v49, %v223_v48  ;;  %v230_v54 = vld [vmem:[#allocation7 + $0x38] sm:$0xff]  ;;  %v227_v55 = vld [vmem:[#allocation7 + $0x20] sm:$0xff]  ;;  %v229_v58 = vld [vmem:[#allocation7 + $0x30] sm:$0xff] }
  0x44   :  { %v466_v57 = vpack.c.bf16 %v230_v54, %v228_v53  ;;  %v232_v59 = vld [vmem:[#allocation7 + $0x48] sm:$0xff]  ;;  %v234_v60 = vld [vmem:[#allocation7 + $0x58] sm:$0xff]  ;;  %463 = vmatprep.subr.bf16.mxu1 %v462_v51  ;;  %v468_v63 = vpack.c.bf16 %v229_v58, %v227_v55  ;;  %v98_v1 = vld [vmem:[#allocation5 + $0x100] sm:$0xff] }
  0x45   :  { %v99_v61 = vld [vmem:[#allocation5 + $0x108] sm:$0xff]  ;;  %v101_v62 = vld [vmem:[#allocation5 + $0x118] sm:$0xff]  ;;  %465 = vmatpush1.bf16.msra.mxu1 %v464_v52  ;;  %v470_v2 = vpack.c.bf16 %v234_v60, %v232_v59  ;;  %v231_v3 = vld [vmem:[#allocation7 + $0x40] sm:$0xff] }
  0x46   :  { %413 = vmatpush1.bf16.msra.mxu0 %v412_v25  ;;  %467 = vmatprep.subr.bf16.mxu1 %v466_v57  ;;  %v233_v4 = vld [vmem:[#allocation7 + $0x50] sm:$0xff]  ;;  %v430_v5 = vpack.c.bf16 %v101_v62, %v99_v61  ;;  %v236_v7 = vld [vmem:[#allocation7 + $0x68] sm:$0xff]  ;;  %v238_v8 = vld [vmem:[#allocation7 + $0x78] sm:$0xff] }
  0x47   :  { %415 = vmatprep.subr.bf16.mxu0 %v414_v26  ;;  %v100_v6 = vld [vmem:[#allocation5 + $0x110] sm:$0xff]  ;;  %v103_v9 = vld [vmem:[#allocation5 + $0x128] sm:$0xff]  ;;  %v105_v10 = vld [vmem:[#allocation5 + $0x138] sm:$0xff]  ;;  %v472_v11 = vpack.c.bf16 %v233_v4, %v231_v3  ;;  %v474_v14 = vpack.c.bf16 %v238_v8, %v236_v7 }
  0x48   :  { %v432_v12 = vpack.c.bf16 %v100_v6, %v98_v1  ;;  %v102_v13 = vld [vmem:[#allocation5 + $0x120] sm:$0xff]  ;;  %v237_v16 = vld [vmem:[#allocation7 + $0x70] sm:$0xff]  ;;  %v434_v17 = vpack.c.bf16 %v105_v10, %v103_v9  ;;  %v240_v19 = vld [vmem:[#allocation7 + $0x88] sm:$0xff] }
  0x49   :  { %469 = vmatpush1.bf16.msra.mxu1 %v468_v63  ;;  %v235_v15 = vld [vmem:[#allocation7 + $0x60] sm:$0xff]  ;;  %v104_v18 = vld [vmem:[#allocation5 + $0x130] sm:$0xff]  ;;  %v242_v20 = vld [vmem:[#allocation7 + $0x98] sm:$0xff] }
  0x4a   :  { %417 = vmatpush1.bf16.msra.mxu0 %v416_v31  ;;  %471 = vmatprep.subr.bf16.mxu1 %v470_v2  ;;  %v107_v21 = vld [vmem:[#allocation5 + $0x148] sm:$0xff]  ;;  %v109_v22 = vld [vmem:[#allocation5 + $0x158] sm:$0xff]  ;;  %v476_v23 = vpack.c.bf16 %v237_v16, %v235_v15  ;;  %v436_v24 = vpack.c.bf16 %v104_v18, %v102_v13  ;;  %v106_v25 = vld [vmem:[#allocation5 + $0x140] sm:$0xff]  ;;  %v478_v26 = vpack.c.bf16 %v242_v20, %v240_v19 }
  0x4b   :  { %419 = vmatprep.subr.bf16.mxu0 %v418_v32  ;;  %v239_v27 = vld [vmem:[#allocation7 + $0x80] sm:$0xff]  ;;  %v241_v28 = vld [vmem:[#allocation7 + $0x90] sm:$0xff]  ;;  %v438_v29 = vpack.c.bf16 %v109_v22, %v107_v21  ;;  %v244_v31 = vld [vmem:[#allocation7 + $0xa8] sm:$0xff] }
  0x4c   :  { %v108_v30 = vld [vmem:[#allocation5 + $0x150] sm:$0xff]  ;;  %v246_v32 = vld [vmem:[#allocation7 + $0xb8] sm:$0xff]  ;;  %v111_v33 = vld [vmem:[#allocation5 + $0x168] sm:$0xff]  ;;  %v480_v35 = vpack.c.bf16 %v241_v28, %v239_v27 }
  0x4d   :  { %473 = vmatpush1.bf16.msra.mxu1 %v472_v11  ;;  %v113_v34 = vld [vmem:[#allocation5 + $0x178] sm:$0xff]  ;;  %v440_v36 = vpack.c.bf16 %v108_v30, %v106_v25  ;;  %v243_v39 = vld [vmem:[#allocation7 + $0xa0] sm:$0xff]  ;;  %v245_v40 = vld [vmem:[#allocation7 + $0xb0] sm:$0xff] }
  0x4e   :  { %421 = vmatpush1.bf16.msra.mxu0 %v420_v37  ;;  %475 = vmatprep.subr.bf16.mxu1 %v474_v14  ;;  %v110_v37 = vld [vmem:[#allocation5 + $0x160] sm:$0xff]  ;;  %v442_v41 = vpack.c.bf16 %v113_v34, %v111_v33  ;;  %v112_v42 = vld [vmem:[#allocation5 + $0x170] sm:$0xff]  ;;  %v248_v43 = vld [vmem:[#allocation7 + $0xc8] sm:$0xff]  ;;  %v484_v47 = vpack.c.bf16 %v245_v40, %v243_v39 }
  0x4f   :  { %423 = vmatprep.subr.bf16.mxu0 %v422_v38  ;;  %v482_v38 = vpack.c.bf16 %v246_v32, %v244_v31  ;;  %v250_v44 = vld [vmem:[#allocation7 + $0xd8] sm:$0xff]  ;;  %v115_v45 = vld [vmem:[#allocation5 + $0x188] sm:$0xff]  ;;  %v444_v48 = vpack.c.bf16 %v112_v42, %v110_v37  ;;  %v114_v49 = vld [vmem:[#allocation5 + $0x180] sm:$0xff] }
  0x50   :  { %v117_v46 = vld [vmem:[#allocation5 + $0x198] sm:$0xff]  ;;  %v247_v51 = vld [vmem:[#allocation7 + $0xc0] sm:$0xff]  ;;  %v249_v52 = vld [vmem:[#allocation7 + $0xd0] sm:$0xff] }
  0x51   :  { %477 = vmatpush1.bf16.msra.mxu1 %v476_v23  ;;  %v446_v53 = vpack.c.bf16 %v117_v46, %v115_v45  ;;  %v116_v54 = vld [vmem:[#allocation5 + $0x190] sm:$0xff]  ;;  %v252_v55 = vld [vmem:[#allocation7 + $0xe8] sm:$0xff]  ;;  %v121_v58 = vld [vmem:[#allocation5 + $0x1b8] sm:$0xff]  ;;  %v488_v59 = vpack.c.bf16 %v249_v52, %v247_v51 }
  0x52   :  { %425 = vmatpush1.bf16.msra.mxu0 %v424_v50  ;;  %479 = vmatprep.subr.bf16.mxu1 %v478_v26  ;;  %v486_v50 = vpack.c.bf16 %v250_v44, %v248_v43  ;;  %v119_v57 = vld [vmem:[#allocation5 + $0x1a8] sm:$0xff]  ;;  %v448_v60 = vpack.c.bf16 %v116_v54, %v114_v49  ;;  %v118_v61 = vld [vmem:[#allocation5 + $0x1a0] sm:$0xff]  ;;  %v120_v2 = vld [vmem:[#allocation5 + $0x1b0] sm:$0xff] }
  0x53   :  { %427 = vmatprep.subr.bf16.mxu0 %v426_v56  ;;  %v254_v56 = vld [vmem:[#allocation7 + $0xf8] sm:$0xff]  ;;  %v251_v63 = vld [vmem:[#allocation7 + $0xe0] sm:$0xff]  ;;  %v450_v1 = vpack.c.bf16 %v121_v58, %v119_v57  ;;  %v256_v3 = vld [vmem:[#allocation7 + $0x108] sm:$0xff]  ;;  %v452_v8 = vpack.c.bf16 %v120_v2, %v118_v61 }
  0x54   :  { %v490_v62 = vpack.c.bf16 %v254_v56, %v252_v55  ;;  %v258_v4 = vld [vmem:[#allocation7 + $0x118] sm:$0xff]  ;;  %v122_v9 = vld [vmem:[#allocation5 + $0x1c0] sm:$0xff]  ;;  %v124_v14 = vld [vmem:[#allocation5 + $0x1d0] sm:$0xff] }
  0x55   :  { %481 = vmatpush1.bf16.msra.mxu1 %v480_v35  ;;  %v125_v6 = vld [vmem:[#allocation5 + $0x1d8] sm:$0xff]  ;;  %v494_v10 = vpack.c.bf16 %v258_v4, %v256_v3  ;;  %v255_v11 = vld [vmem:[#allocation7 + $0x100] sm:$0xff]  ;;  %v260_v15 = vld [vmem:[#allocation7 + $0x128] sm:$0xff]  ;;  %v456_v20 = vpack.c.bf16 %v124_v14, %v122_v9  ;;  %v132_v4 = vlaneseq }
  0x56   :  { %429 = vmatpush1.bf16.msra.mxu0 %v428_v0  ;;  %483 = vmatprep.subr.bf16.mxu1 %v482_v38  ;;  %v253_v0 = vld [vmem:[#allocation7 + $0xf0] sm:$0xff]  ;;  %v262_v16 = vld [vmem:[#allocation7 + $0x138] sm:$0xff]  ;;  %v126_v21 = vld [vmem:[#allocation5 + $0x1e0] sm:$0xff] }
  0x57   :  { %431 = vmatprep.subr.bf16.mxu0 %v430_v5  ;;  %v123_v5 = vld [vmem:[#allocation5 + $0x1c8] sm:$0xff]  ;;  %v492_v7 = vpack.c.bf16 %v253_v0, %v251_v63  ;;  %v129_v18 = vld [vmem:[#allocation5 + $0x1f8] sm:$0xff]  ;;  %v498_v22 = vpack.c.bf16 %v262_v16, %v260_v15  ;;  %v259_v23 = vld [vmem:[#allocation7 + $0x120] sm:$0xff] }
  0x58   :  { %v454_v13 = vpack.c.bf16 %v125_v6, %v123_v5  ;;  %v128_v26 = vld [vmem:[#allocation5 + $0x1f0] sm:$0xff]  ;;  %v264_v27 = vld [vmem:[#allocation7 + $0x148] sm:$0xff]  ;;  %v266_v28 = vld [vmem:[#allocation7 + $0x158] sm:$0xff]  ;;  %v133_v5 = vshrl.u32 %v132_v4, 7 }
  0x59   :  { %485 = vmatpush1.bf16.msra.mxu1 %v484_v47  ;;  %v460_v30 = vpack.c.bf16 %v128_v26, %v126_v21  ;;  %v502_v31 = vpack.c.bf16 %v266_v28, %v264_v27  ;;  %v263_v32 = vld [vmem:[#allocation7 + $0x140] sm:$0xff]  ;;  %v265_v33 = vld [vmem:[#allocation7 + $0x150] sm:$0xff]  ;;  %v268_v34 = vld [vmem:[#allocation7 + $0x168] sm:$0xff] }
  0x5a   :  { %433 = vmatpush1.bf16.msra.mxu0 %v432_v12  ;;  %487 = vmatprep.subr.bf16.mxu1 %v486_v50  ;;  %v257_v12 = vld [vmem:[#allocation7 + $0x110] sm:$0xff]  ;;  %v270_v35 = vld [vmem:[#allocation7 + $0x178] sm:$0xff]  ;;  %v62_v37 = vld [vmem:[#allocation2] sm:$0xff]  ;;  %v134_v6 = vsub.s32 0, %v133_v5 }
  0x5b   :  { %435 = vmatprep.subr.bf16.mxu0 %v434_v17  ;;  %v127_v17 = vld [vmem:[#allocation5 + $0x1e8] sm:$0xff]  ;;  %v496_v19 = vpack.c.bf16 %v257_v12, %v255_v11  ;;  %v506_v38 = vpack.c.bf16 %v270_v35, %v268_v34  ;;  %v267_v39 = vld [vmem:[#allocation7 + $0x160] sm:$0xff]  ;;  %v269_v40 = vld [vmem:[#allocation7 + $0x170] sm:$0xff] }
  0x5c   :  { %v458_v25 = vpack.c.bf16 %v129_v18, %v127_v17  ;;  %v272_v42 = vld [vmem:[#allocation7 + $0x188] sm:$0xff]  ;;  %v274_v43 = vld [vmem:[#allocation7 + $0x198] sm:$0xff]  ;;  %v508_v44 = vpack.c.bf16 %v269_v40, %v267_v39  ;;  %v64_v45 = vld [vmem:[#allocation2 + $0x10] sm:$0xff] }
  0x5d   :  { %489 = vmatpush1.bf16.msra.mxu1 %v488_v59  ;;  %v510_v46 = vpack.c.bf16 %v274_v43, %v272_v42  ;;  %v271_v47 = vld [vmem:[#allocation7 + $0x180] sm:$0xff]  ;;  %v276_v49 = vld [vmem:[#allocation7 + $0x1a8] sm:$0xff]  ;;  %v278_v50 = vld [vmem:[#allocation7 + $0x1b8] sm:$0xff] }
  0x5e   :  { %437 = vmatpush1.bf16.msra.mxu0 %v436_v24  ;;  %491 = vmatprep.subr.bf16.mxu1 %v490_v62  ;;  %v261_v24 = vld [vmem:[#allocation7 + $0x130] sm:$0xff]  ;;  %v514_v52 = vpack.c.bf16 %v278_v50, %v276_v49  ;;  %v280_v55 = vld [vmem:[#allocation7 + $0x1c8] sm:$0xff]  ;;  %v282_v56 = vld [vmem:[#allocation7 + $0x1d8] sm:$0xff] }
  0x5f   :  { %439 = vmatprep.subr.bf16.mxu0 %v438_v29  ;;  %v500_v29 = vpack.c.bf16 %v261_v24, %v259_v23  ;;  %v277_v54 = vld [vmem:[#allocation7 + $0x1b0] sm:$0xff]  ;;  %v518_v58 = vpack.c.bf16 %v282_v56, %v280_v55  ;;  %v279_v59 = vld [vmem:[#allocation7 + $0x1c0] sm:$0xff]  ;;  %v284_v62 = vld [vmem:[#allocation7 + $0x1e8] sm:$0xff] }
  0x60   :  { %v286_v63 = vld [vmem:[#allocation7 + $0x1f8] sm:$0xff]  ;;  %v285_v2 = vld [vmem:[#allocation7 + $0x1f0] sm:$0xff]  ;;  %v287_v23 = vld [vmem:[%s739_s4] sm:$0x3] }
  0x61   :  { %493 = vmatpush1.bf16.msra.mxu1 %v492_v7  ;;  %v522_v0 = vpack.c.bf16 %v286_v63, %v284_v62  ;;  %v130_v7 = vld [vmem:[%s737_s2] sm:$0x3]  ;;  %v292_v24 = vrot.slane %v287_v23, %v134_v6 }
  0x62   :  { %441 = vmatpush1.bf16.msra.mxu0 %v440_v36  ;;  %495 = vmatprep.subr.bf16.mxu1 %v494_v10  ;;  %v504_v36 = vpack.c.bf16 %v265_v33, %v263_v32  ;;  %v135_v9 = vrot.slane %v130_v7, %v134_v6 }
  0x63   :  { %443 = vmatprep.subr.bf16.mxu0 %v442_v41  ;;  %v65_v41 = vld [vmem:[#allocation2 + $0x18] sm:$0xff] }
  0x65   :  { %497 = vmatpush1.bf16.msra.mxu1 %v496_v19 }
  0x66   :  { %445 = vmatpush1.bf16.msra.mxu0 %v444_v48  ;;  %499 = vmatprep.subr.bf16.mxu1 %v498_v22  ;;  %v273_v48 = vld [vmem:[#allocation7 + $0x190] sm:$0xff] }
  0x67   :  { %447 = vmatprep.subr.bf16.mxu0 %v446_v53  ;;  %v512_v51 = vpack.c.bf16 %v273_v48, %v271_v47  ;;  %v275_v53 = vld [vmem:[#allocation7 + $0x1a0] sm:$0xff] }
  0x68   :  { %v516_v57 = vpack.c.bf16 %v277_v54, %v275_v53 }
  0x69   :  { %501 = vmatpush1.bf16.msra.mxu1 %v500_v29 }
  0x6a   :  { %449 = vmatpush1.bf16.msra.mxu0 %v448_v60  ;;  %503 = vmatprep.subr.bf16.mxu1 %v502_v31  ;;  %v281_v60 = vld [vmem:[#allocation7 + $0x1d0] sm:$0xff] }
  0x6b   :  { %451 = vmatprep.subr.bf16.mxu0 %v450_v1  ;;  %v520_v61 = vpack.c.bf16 %v281_v60, %v279_v59  ;;  %v283_v1 = vld [vmem:[#allocation7 + $0x1e0] sm:$0xff] }
  0x6c   :  { %v524_v3 = vpack.c.bf16 %v285_v2, %v283_v1 }
  0x6d   :  { %505 = vmatpush1.bf16.msra.mxu1 %v504_v36 }
  0x6e   :  { %453 = vmatpush1.bf16.msra.mxu0 %v452_v8  ;;  %507 = vmatprep.subr.bf16.mxu1 %v506_v38  ;;  %v138_v8 = vsub.s32 1, %v133_v5 }
  0x6f   :  { %455 = vmatprep.subr.bf16.mxu0 %v454_v13 }
  0x70   :  { %v139_v10 = vrot.slane %v130_v7, %v138_v8 }
  0x71   :  { %509 = vmatpush1.bf16.msra.mxu1 %v508_v44 }
  0x72   :  { %457 = vmatpush1.bf16.msra.mxu0 %v456_v20  ;;  %511 = vmatprep.subr.bf16.mxu1 %v510_v46 }
  0x73   :  { %459 = vmatprep.subr.bf16.mxu0 %v458_v25  ;;  %v296_v25 = vrot.slane %v287_v23, %v138_v8 }
  0x75   :  { %513 = vmatpush1.bf16.msra.mxu1 %v512_v51 }
  0x76   :  { %461 = vmatpush1.bf16.msra.mxu0 %v460_v30  ;;  %515 = vmatprep.subr.bf16.mxu1 %v514_v52 }
  0x79   :  { %207 = vmatmul.mubr.f32.vlgmr.msra.gmra.mrb[0].mxu0 %v62_v37  ;;  %517 = vmatpush1.bf16.msra.mxu1 %v516_v57 }
  0x7a   :  { %212 = vmatprep.mubr.f32.mxu0 %v65_v41  ;;  %519 = vmatprep.subr.bf16.mxu1 %v518_v58 }
  0x7d   :  { %213 = vmatmul.mubr.f32.gmra.mrb[2].mxu0 %v64_v45  ;;  %521 = vmatpush1.bf16.msra.mxu1 %v520_v61 }
  0x7e   :  { %523 = vmatprep.subr.bf16.mxu1 %v522_v0 }
  0x81   :  { %525 = vmatpush1.bf16.msra.mxu1 %v524_v3 }
 0x14c   :  { %v208_v11 = vpop.f32.mrb[0].mxu0 }
 0x14d   :  { %v209_v12 = vadd.f32 %v208_v11, %v135_v9  ;;  %v210_v13 = vpop.f32.mrb[1].mxu0 }
 0x14e   :  { %v211_v14 = vadd.f32 %v210_v13, %v139_v10 }
 0x14f   :  { %v219_v17 = vmax.f32 %v209_v12, 0.0 }
 0x150   :  { %v214_v15 = vpop.f32.mrb[2].mxu0  ;;  %v220_v16 = vmax.f32 %v211_v14, 0.0 }
 0x151   :  { %v215_v18 = vadd.f32 %v214_v15, %v135_v9  ;;  %v216_v19 = vpop.f32.mrb[3].mxu0 }
 0x152   :  { %v217_v20 = vadd.f32 %v216_v19, %v139_v10  ;;  %363 = vmatprep.mubr.f32.mxu1 %v220_v16 }
 0x153   :  { %364 = vmatmul.mubr.f32.vlgmr.msra.gmra.mrb[0].mxu1 %v219_v17  ;;  %v221_v22 = vmax.f32 %v215_v18, 0.0 }
 0x154   :  { %v222_v21 = vmax.f32 %v217_v20, 0.0 }
 0x156   :  { %369 = vmatprep.mubr.f32.mxu1 %v222_v21 }
 0x157   :  { %370 = vmatmul.mubr.f32.gmra.mrb[2].mxu1 %v221_v22 }
 0x226   :  { %v365_v26 = vpop.f32.mrb[0].mxu1 }
 0x227   :  { %v366_v27 = vadd.f32 %v365_v26, %v292_v24  ;;  %v367_v28 = vpop.f32.mrb[1].mxu1 }
 0x228   :  { %v368_v29 = vadd.f32 %v367_v28, %v296_v25 }
 0x229   :  { %376 = vst [vmem:[#allocation8] sm:$0xff] %v366_v27 }
 0x22a   :  { %377 = vst [vmem:[#allocation8 + $0x8] sm:$0xff] %v368_v29  ;;  %v371_v30 = vpop.f32.mrb[2].mxu1 }
 0x22b   :  { %v372_v31 = vadd.f32 %v371_v30, %v292_v24  ;;  %v373_v32 = vpop.f32.mrb[3].mxu1 }
 0x22c   :  { %v374_v33 = vadd.f32 %v373_v32, %v296_v25 }
 0x22d   :  { %378 = vst [vmem:[#allocation8 + $0x10] sm:$0xff] %v372_v31 }
 0x22e   :  { %379 = vst [vmem:[#allocation8 + $0x18] sm:$0xff] %v374_v33 }
 0x22f   :  { %609 = shalt.err (!%p606_p0)
}
 0x230   :  { %s610_s12 = scalar_lea.hbm %s740_s5, 512 }
 0x231   :  { %p611_p1 = scmp.ne.s32.totalorder %s740_s5, %s610_s12  ;;  %p614_p2 = scmp.lt.u32.totalorder %s610_s12, %s740_s5 }
 0x233   :  { %p616_p3 = pnand %p614_p2, %p611_p1 }
 0x235   :  { %619 = shalt.err (!%p616_p3)
}
 0x236   :  { %391 = dma.vmem_to_hbm [thread:$0]  %s386_s9, 512, %s740_s5, [#allocation4], %s628_s30, %s628_s30, %s629_s6  }
 0x237   :  { %624 = dma.done.wait [#allocation4], 512  }
 0x238   :  { %625 = vsyncadd [#allocation4], 4294966784 }
 0x239   :  { %395 = vsyncpa [#allocation3], 1 }
 0x23a   :  { %396 = vsyncpa [#allocation6], 1 }
 0x23b   :  { %397 = vsyncpa [#allocation4], 1 }

</bundles_post_ra>
